<compile_context>
chip_gen: v7x
topology: tpu7x:2x2x1
jax: 0.10.0
libtpu: 0.0.40
codegen_flags: <defaults>
</compile_context>

<pallas_src>
import jax
import jax.numpy as jnp
from jax.experimental import pallas as pl
from jax.experimental.pallas import tpu as pltpu

_SUBLANE = 8
_LANE = 128
# Target ~4 MiB per x tile: large enough to amortize the ~0.35 us grid-step
# overhead and approach the HBM roofline, small enough that the double-buffered
# working set (~8-10 MiB) fits the 32 MiB scoped-VMEM default everywhere.
_X_TILE_BYTES = 4 * 1024 * 1024


def _round_up(x, m):
    return (x + m - 1) // m * m


def _choose_tiles(batch, dim, dtype_bytes=4):
    """Pick (batch_tile, dim_tile, padded_batch) for the pipelined GEMV."""
    # Reduction tile: full D when modest; otherwise the largest 128-multiple
    # divisor of D so partial K tiles never read out of bounds.
    if dim <= 2048 or dim % _LANE != 0:
        td = dim
    else:
        td = dim
        for cand in (2048, 1024, 512, 256, 128):
            if dim % cand == 0:
                td = cand
                break
    # Batch tile from the VMEM budget (multiple of 8 sublanes, capped at 2048).
    tb = _X_TILE_BYTES // (td * dtype_bytes)
    tb = max(_SUBLANE, min(2048, (tb // _SUBLANE) * _SUBLANE))
    b_pad = _round_up(batch, _SUBLANE)
    if tb >= b_pad:
        tb = b_pad
    else:
        b_pad = _round_up(batch, tb)
    return tb, td, b_pad


def _linear_kernel(x_ref, w_ref, b_ref, o_ref, acc_ref):
    # x_ref: (TB, TD) VMEM, w_ref: (TD, 1) VMEM, b_ref: (1,) SMEM scalar,
    # o_ref: (TB, 1), acc_ref: (TB, 1) f32 accumulator (resident across K).
    k = pl.program_id(1)

    @pl.when(k == 0)
    def _init():
        acc_ref[...] = jnp.zeros_like(acc_ref)

    acc_ref[...] += jnp.dot(x_ref[...], w_ref[...],
                            preferred_element_type=jnp.float32)

    @pl.when(k == pl.num_programs(1) - 1)
    def _finalize():
        # Output last dim of 1 -> masked store, but output bytes are tiny
        # relative to the streamed x reads, so this is negligible.
        o_ref[...] = (acc_ref[...] + b_ref[0]).astype(o_ref.dtype)


@jax.jit
def single_layer_linear(x, w, b):
    """Pallas equivalent of nn.Linear(dim, 1): y = x @ w + b.

    x: (B, D) float32
    w: (D, 1) float32  (transpose of PyTorch's (1, D) weight)
    b: (1,)   float32
    returns: (B, 1) float32
    """
    batch, dim = x.shape
    tb, td, b_pad = _choose_tiles(batch, dim)
    if b_pad != batch:
        # Pad the batch so every tile is full (rows of zeros give y = b, and
        # the padded rows are sliced away below).
        x = jnp.pad(x, ((0, b_pad - batch), (0, 0)))
    grid = (b_pad // tb, dim // td)

    cost = pl.CostEstimate(
        flops=2 * b_pad * dim,
        transcendentals=0,
        bytes_accessed=4 * (b_pad * dim + dim + b_pad),
    )

    out = pl.pallas_call(
        _linear_kernel,
        out_shape=jax.ShapeDtypeStruct((b_pad, 1), x.dtype),
        grid_spec=pltpu.PrefetchScalarGridSpec(
            num_scalar_prefetch=0,
            grid=grid,
            in_specs=[
                # x: tiled over batch (pipelined) and the reduction dim.
                pl.BlockSpec((tb, td), lambda i, k: (i, k)),
                # w: tiny; only re-fetched along the reduction axis.
                pl.BlockSpec((td, 1), lambda i, k: (k, 0)),
                # bias: scalar kept in SMEM, resident for the whole grid.
                pl.BlockSpec(memory_space=pltpu.MemorySpace.SMEM),
            ],
            # Same output block across k => output stays resident over the
            # reduction axis (accumulator pattern).
            out_specs=pl.BlockSpec((tb, 1), lambda i, k: (i, 0)),
            scratch_shapes=[pltpu.VMEM((tb, 1), jnp.float32)],
        ),
        compiler_params=pltpu.CompilerParams(
            # Batch axis parallel (shards grid steps across v7x's 2 TCs;
            # neutral on v5e/v6e); reduction axis must stay sequential.
            dimension_semantics=("parallel", "arbitrary"),
        ),
        cost_estimate=cost,
    )(x, w, b)

    if b_pad != batch:
        out = out[:batch]
    return out


if __name__ == "__main__":
    dim = 32
    batch = 8

    key = jax.random.PRNGKey(0)
    kx, kw, kb = jax.random.split(key, 3)

    # Deterministic parameter init mimicking PyTorch nn.Linear default:
    # uniform(-1/sqrt(dim), 1/sqrt(dim)) for both weight and bias.
    bound = 1.0 / (dim ** 0.5)
    w = jax.random.uniform(kw, (dim, 1), jnp.float32, minval=-bound, maxval=bound)
    b = jax.random.uniform(kb, (1,), jnp.float32, minval=-bound, maxval=bound)

    x = jax.random.normal(kx, (batch, dim), jnp.float32)

    out = single_layer_linear(x, w, b)
    out = jax.block_until_ready(out)

    # Reference check against plain JAX.
    ref = x @ w + b[None, :]
    assert out.shape == (batch, 1)
    assert jnp.allclose(out, ref, atol=1e-5, rtol=1e-5)

    print("KERNEL_OK")
</pallas_src>

<mosaic_0001>
module attributes {stable_mosaic.version = 11 : i64} {
  func.func @_linear_kernel(%arg0: i32, %arg1: i32, %arg2: memref<8x32xf32, #tpu.memory_space<vmem>>, %arg3: memref<32x1xf32, #tpu.memory_space<vmem>>, %arg4: memref<1xf32, #tpu.memory_space<smem>>, %arg5: memref<8x1xf32, #tpu.memory_space<vmem>>, %arg6: memref<8x1xf32, #tpu.memory_space<vmem>>) attributes {dimension_semantics = [#tpu.dimension_semantics<parallel>, #tpu.dimension_semantics<arbitrary>], iteration_bounds = array<i64: 1, 1>, scalar_prefetch = 0 : i64, scratch_operands = 1 : i64, tpu.core_type = #tpu.core_type<tc>, window_params = [{transform_indices = @transform_0, window_bounds = array<i64: 8, 32>}, {transform_indices = @transform_1, window_bounds = array<i64: 32, 1>}, {transform_indices = @transform_2, window_bounds = array<i64: 1>}, {transform_indices = @transform_3, window_bounds = array<i64: 8, 1>}]} {
    %c0_i32 = arith.constant 0 : i32
    %0 = arith.cmpi eq, %arg1, %c0_i32 : i32
    %1 = arith.extui %0 : i1 to i32
    %c0_i32_0 = arith.constant 0 : i32
    %2 = arith.cmpi ne, %1, %c0_i32_0 : i32
    scf.if %2 {
      %cst_10 = arith.constant 0.000000e+00 : f32
      %12 = vector.broadcast %cst_10 : f32 to vector<8x1xf32>
      %c0_11 = arith.constant 0 : index
      %c0_12 = arith.constant 0 : index
      %13 = vector.load %arg6[%c0_11, %c0_12] : memref<8x1xf32, #tpu.memory_space<vmem>>, vector<8x1xf32>
      tpu.vector_store %arg6[%c0_11, %c0_12], %12 {strides = array<i32>} : memref<8x1xf32, #tpu.memory_space<vmem>>, vector<8x1xf32>,
    } else {
    }
    %c0 = arith.constant 0 : index
    %c0_1 = arith.constant 0 : index
    %3 = vector.load %arg6[%c0, %c0_1] : memref<8x1xf32, #tpu.memory_space<vmem>>, vector<8x1xf32>
    %c0_2 = arith.constant 0 : index
    %c0_3 = arith.constant 0 : index
    %4 = vector.load %arg2[%c0_2, %c0_3] : memref<8x32xf32, #tpu.memory_space<vmem>>, vector<8x32xf32>
    %c0_4 = arith.constant 0 : index
    %c0_5 = arith.constant 0 : index
    %5 = vector.load %arg3[%c0_4, %c0_5] : memref<32x1xf32, #tpu.memory_space<vmem>>, vector<32x1xf32>
    %cst = arith.constant dense<0.000000e+00> : vector<8x1xf32>
    %6 = tpu.matmul %4, %5, %cst {dimension_numbers = #tpu.dot_dimension_numbers<[1], [0], [0], [1], [0, 0, 1, 1], [], []>} : vector<8x32xf32>, vector<32x1xf32>, vector<8x1xf32> -> vector<8x1xf32>
    %7 = arith.addf %3, %6 : vector<8x1xf32>
    %c0_6 = arith.constant 0 : index
    %c0_7 = arith.constant 0 : index
    %8 = vector.load %arg6[%c0_6, %c0_7] : memref<8x1xf32, #tpu.memory_space<vmem>>, vector<8x1xf32>
    tpu.vector_store %arg6[%c0_6, %c0_7], %7 {strides = array<i32>} : memref<8x1xf32, #tpu.memory_space<vmem>>, vector<8x1xf32>,
    %c0_i32_8 = arith.constant 0 : i32
    %9 = arith.cmpi eq, %arg1, %c0_i32_8 : i32
    %10 = arith.extui %9 : i1 to i32
    %c0_i32_9 = arith.constant 0 : i32
    %11 = arith.cmpi ne, %10, %c0_i32_9 : i32
    scf.if %11 {
      %c0_10 = arith.constant 0 : index
      %c0_11 = arith.constant 0 : index
      %12 = vector.load %arg6[%c0_10, %c0_11] : memref<8x1xf32, #tpu.memory_space<vmem>>, vector<8x1xf32>
      %c0_12 = arith.constant 0 : index
      %13 = memref.load %arg4[%c0_12] : memref<1xf32, #tpu.memory_space<smem>>
      %14 = vector.broadcast %13 : f32 to vector<8x1xf32>
      %15 = arith.addf %12, %14 : vector<8x1xf32>
      %c0_13 = arith.constant 0 : index
      %c0_14 = arith.constant 0 : index
      %16 = vector.load %arg5[%c0_13, %c0_14] : memref<8x1xf32, #tpu.memory_space<vmem>>, vector<8x1xf32>
      tpu.vector_store %arg5[%c0_13, %c0_14], %15 {strides = array<i32>} : memref<8x1xf32, #tpu.memory_space<vmem>>, vector<8x1xf32>,
    } else {
    }
    return
  }
  func.func @transform_0(%arg0: i32, %arg1: i32) -> (i32, i32) {
    %c0_i32 = arith.constant 0 : i32
    return %arg0, %arg1 : i32, i32
  }
  func.func @transform_1(%arg0: i32, %arg1: i32) -> (i32, i32) {
    %c0_i32 = arith.constant 0 : i32
    %c0_i32_0 = arith.constant 0 : i32
    return %arg1, %c0_i32 : i32, i32
  }
  func.func @transform_2(%arg0: i32, %arg1: i32) -> i32 {
    %c0_i32 = arith.constant 0 : i32
    %c0_i32_0 = arith.constant 0 : i32
    return %c0_i32 : i32
  }
  func.func @transform_3(%arg0: i32, %arg1: i32) -> (i32, i32) {
    %c0_i32 = arith.constant 0 : i32
    %c0_i32_0 = arith.constant 0 : i32
    return %arg0, %c0_i32 : i32, i32
  }
}

</mosaic_0001>

<bundles_post_ra>
// kernel: single_layer_linear.1
= control target key start
LH: loop header
LB: loop body
LE: loop exit
PB: predicated region body
PF: predicated region fallthrough
CT: control target
= control target key end

     0   :  { %vm19_vm0 = vcmask 7168   ;;  %v142_v0 = vmov 0.0|0.0   ;;  %v143_v4 = vmov 0.0   ;;  %vm144_vm1 = vmmov 0   ;;  %s189_s1 = inlined_call_operand.vmem [shape: f32[32,1], index: 1, kind: input, shape index: {}]   ;;  %s190_s0 = inlined_call_operand.vmem [shape: f32[8,32], index: 0, kind: input, shape index: {}]   ;;  %s191_s2 = inlined_call_operand.<no memory space> [shape: f32[1], index: 2, kind: input, shape index: {}]   ;;  %s192_s3 = inlined_call_operand.vmem [shape: f32[8,1], index: 3, kind: output, shape index: {}]  }
   0x1   :  { %133 = vmatprep.subr.bf16.mxu0 %v142_v0  ;;  %v23_v1 = vld [vmem:[%s189_s1] sm:$0xff]  ;;  %v24_v2 = vld [vmem:[%s189_s1 + $0x8] sm:$0xff]  ;;  %v25_v3 = vld [vmem:[%s189_s1 + $0x10] sm:$0xff]  ;;  %20 = vst.msk [vmem:[#allocation2] sm:$0xff] %vm19_vm0, %v143_v4  ;;  %130 = vmatprep.mubr.msk.f32.mxu0 %vm144_vm1, %v143_v4  ;;  %vm27_vm2 = vcmask 261120   ;;  %v109_v13 = vstv %s191_s2 }
   0x2   :  { %v134_v5 = vpack.c.bf16 %v24_v2, %v23_v1  ;;  %v26_v6 = vld [vmem:[%s189_s1 + $0x18] sm:$0xff]  ;;  %v22_v8 = vld [vmem:[%s190_s0] sm:$0xff] }
   0x3   :  { %v137_v7 = vpack.c.bf16 %v26_v6, %v25_v3 }
   0x4   :  { %135 = vmatpush3.bf16.msra.mxu0 %v134_v5 }
   0x5   :  { %136 = vmatprep.subr.bf16.mxu0 %v142_v0 }
   0x8   :  { %138 = vmatpush3.bf16.msra.mxu0 %v137_v7  ;;  %v21_v9 = vld [vmem:[#allocation2] sm:$0xff] }
   0xb   :  { %131 = vmatmul.mubr.msk.f32.vlgmr.msra.gmra.mrb[0].mxu0 %vm27_vm2, %v22_v8 }
  0xde   :  { %v97_v10 = vpop.f32.mrb[0].mxu0 }
  0xdf   :  { %v101_v11 = vadd.f32 %v97_v10, %v21_v9  ;;  %v132_v12 = vpop.f32.mrb[1].mxu0 }
  0xe1   :  { %103 = vst.msk [vmem:[#allocation2] sm:$0xff] %vm19_vm0, %v101_v11 }
  0xe8   :  { %v107_v14 = vld [vmem:[#allocation2] sm:$0xff] }
  0xe9   :  { %v110_v15 = vadd.f32 %v109_v13, %v107_v14 }
  0xeb   :  { %111 = vst.msk [vmem:[%s192_s3] sm:$0xff] %vm19_vm0, %v110_v15 }

</bundles_post_ra>
